<compile_context>
chip_gen: v7x
topology: tpu7x:2x2x1
jax: 0.10.0
libtpu: 0.0.40
codegen_flags: <defaults>
</compile_context>

<pallas_src>
import functools
import math

import jax
import jax.numpy as jnp
from jax.experimental import pallas as pl
from jax.experimental.pallas import tpu as pltpu


def _round_up(v, m):
    return ((v + m - 1) // m) * m


def kan_kernel(x_ref, scale_ref, shift_ref, w_ref, o_ref, preact_ref,
               *, n_int, input_dim, mxu_dtype):
    """x_ref: (TB, I) raw input tile; scale/shift: (1, I) folded BN terms;
    w_ref: ((K+1)*I, TO) stacked weights; o_ref: (TB, TO);
    preact_ref: f32 VMEM scratch (TB, (K+1)*I)."""
    I = input_dim
    K = n_int + 3

    # --- fused BatchNorm apply: x*scale + shift == (x - mean)*rsqrt(var+eps)/3 ---
    x = x_ref[...] * scale_ref[...] + shift_ref[...]               # (TB, I) f32

    # --- base path: silu(x) goes into the last I-wide block of the slab ---
    preact_ref[:, K * I:(K + 1) * I] = x * jax.nn.sigmoid(x)

    # --- spline path: cubic B-spline basis, scattered into K bin blocks ---
    xc = jnp.clip(x, -1.0, 1.0)
    inv_gap = n_int / 2.0                                          # 1/gap, gap = 2/n_int
    u = (xc + 1.0) * inv_gap
    idx_f = jnp.minimum(jnp.floor(u), float(n_int - 1))            # clipped interval index
    idx = idx_f.astype(jnp.int32)
    t = u - idx_f                                                  # local coord (single floor)
    t2 = t * t
    t3 = t2 * t
    # [t^3, t^2, t, 1] @ matrixA   (cubic B-spline basis)
    b0 = (-t3 + 3.0 * t2 - 3.0 * t + 1.0) * (1.0 / 6.0)
    b1 = (3.0 * t3 - 6.0 * t2 + 4.0) * (1.0 / 6.0)
    b2 = (-3.0 * t3 + 3.0 * t2 + 3.0 * t + 1.0) * (1.0 / 6.0)
    b3 = t3 * (1.0 / 6.0)

    # bin column k receives b_r wherever idx + r == k
    for k in range(K):
        pk = (jnp.where(idx == k, b0, 0.0)
              + jnp.where(idx == k - 1, b1, 0.0)
              + jnp.where(idx == k - 2, b2, 0.0)
              + jnp.where(idx == k - 3, b3, 0.0))                  # (TB, I)
        preact_ref[:, k * I:(k + 1) * I] = pk

    # --- single MXU matmul over the whole slab: (TB, (K+1)*I) @ ((K+1)*I, TO) ---
    o_ref[...] = jnp.dot(preact_ref[...].astype(mxu_dtype), w_ref[...],
                         preferred_element_type=jnp.float32).astype(o_ref.dtype)


def init_params(key, n_int, input_dim, output_dim):
    coef_scale = math.sqrt(6.0) / math.sqrt(input_dim + output_dim)
    k1, k2 = jax.random.split(key)
    base_scale = ((jax.random.uniform(k1, (input_dim, output_dim)) - 0.5)
                  * 2.0 * coef_scale).astype(jnp.float32)
    spline_scale = jnp.ones((input_dim, output_dim), jnp.float32) * coef_scale
    coef = ((jax.random.uniform(k2, (input_dim, n_int + 3, output_dim)) - 0.5)
            * 2.0 * coef_scale).astype(jnp.float32)
    return {"base_scale": base_scale, "spline_scale": spline_scale, "coef": coef}


def prepare_weights(params, n_int, *, mxu_dtype=jnp.bfloat16):
    """One-time weight transform: fold spline_scale, stack spline+base blocks row-wise
    into ((K+1)*I, O_pad) with O zero-padded to a multiple of 128, cast to MXU dtype."""
    coef = params["coef"].astype(jnp.float32)                       # (I, K, O)
    spline_scale = params["spline_scale"].astype(jnp.float32)       # (I, O)
    base_scale = params["base_scale"].astype(jnp.float32)           # (I, O)
    I, K, O = coef.shape
    assert K == n_int + 3
    # row block k of the stacked weight = coef[:, k, :] * spline_scale   (matches the
    # kernel's column block k of the preactivation slab); last block = base_scale.
    w_spline = (coef * spline_scale[:, None, :]).transpose(1, 0, 2).reshape(K * I, O)
    w = jnp.concatenate([w_spline, base_scale], axis=0)             # ((K+1)*I, O)
    o_pad = _round_up(O, 128)                                       # lane-dense output
    if o_pad != O:
        w = jnp.pad(w, ((0, 0), (0, o_pad - O)))
    return w.astype(mxu_dtype), O


def kan_layer_forward(x, w, n_int, input_dim, output_dim, *,
                      norm_div_term=3.0, eps=1e-5, tb_max=256, to_max=512):
    """Forward of KanLayer_original (norm='bn' training-mode stats, affine=False).

    w is the prepared stacked weight from prepare_weights().
    """
    shape = x.shape
    assert shape[-1] == input_dim
    x2 = x.reshape(-1, input_dim).astype(jnp.float32)
    B = x2.shape[0]

    # BatchNorm1d batch statistics (biased variance, no affine) — cheap (1, I)
    # reductions stay in plain JAX; normalization itself is applied in-kernel.
    # TODO(synk): running_mean/running_var buffer updates (training side effect) not modeled.
    mean = jnp.mean(x2, axis=0, keepdims=True)                      # (1, I)
    var = jnp.mean(jnp.square(x2 - mean), axis=0, keepdims=True)    # (1, I)
    scale = jax.lax.rsqrt(var + eps) / norm_div_term                # (1, I)
    shift = -mean * scale                                           # (1, I)

    rows, o_pad = w.shape                                           # rows = (K+1)*I

    # batch tiling: big tiles for MXU occupancy, clamped so tiny batches stay one tile
    tb = min(tb_max, _round_up(B, 8))
    b_pad = _round_up(B, tb)
    if b_pad != B:
        x2 = jnp.pad(x2, ((0, b_pad - B), (0, 0)))

    # output tiling: keeps the resident weight block bounded (v7x 64 MiB VMEM)
    to = min(to_max, o_pad)

    kernel = functools.partial(kan_kernel, n_int=n_int, input_dim=input_dim,
                               mxu_dtype=w.dtype)

    # Grid: (output tiles, batch tiles) with batch innermost — the stacked-weight
    # block index is constant across consecutive steps, so its DMA is elided.
    out = pl.pallas_call(
        kernel,
        out_shape=jax.ShapeDtypeStruct((b_pad, o_pad), jnp.float32),
        grid_spec=pltpu.PrefetchScalarGridSpec(
            num_scalar_prefetch=0,
            grid=(o_pad // to, b_pad // tb),
            in_specs=[
                pl.BlockSpec((tb, input_dim), lambda o, b: (b, 0)),   # raw x tile
                pl.BlockSpec((1, input_dim), lambda o, b: (0, 0)),    # BN scale
                pl.BlockSpec((1, input_dim), lambda o, b: (0, 0)),    # BN shift
                pl.BlockSpec((rows, to), lambda o, b: (0, o)),        # stacked weights
            ],
            out_specs=pl.BlockSpec((tb, to), lambda o, b: (b, o)),
            scratch_shapes=[pltpu.VMEM((tb, rows), jnp.float32)],     # preactivation slab
        ),
        compiler_params=pltpu.CompilerParams(
            dimension_semantics=("parallel", "parallel")),
    )(x2, scale, shift, w)

    out = out[:B, :output_dim]
    return out.reshape(*shape[:-1], output_dim)


def _reference_forward(x, params, n_int, *, norm_div_term=3.0, eps=1e-5):
    """Pure-JAX f32 dense reference mirroring the PyTorch forward."""
    shape = x.shape
    input_dim = shape[-1]
    x2 = x.reshape(-1, input_dim).astype(jnp.float32)
    mean = jnp.mean(x2, axis=0, keepdims=True)
    var = jnp.mean((x2 - mean) ** 2, axis=0, keepdims=True)
    xn = (x2 - mean) / jnp.sqrt(var + eps) / norm_div_term

    coef = params["coef"] * params["spline_scale"][:, None, :]      # (I, K, O)
    K = coef.shape[1]
    O = coef.shape[2]

    xc = jnp.clip(xn, -1.0, 1.0)
    gap = 2.0 / n_int
    idx = jnp.minimum(jnp.floor((xc + 1.0) / gap).astype(jnp.int32), n_int - 1)
    t = jnp.mod(xc + 1.0, gap) / gap
    t2, t3 = t * t, t * t * t
    basis = jnp.stack([(-t3 + 3 * t2 - 3 * t + 1) / 6,
                       (3 * t3 - 6 * t2 + 4) / 6,
                       (-3 * t3 + 3 * t2 + 3 * t + 1) / 6,
                       t3 / 6], axis=-1)                             # (B, I, 4)
    cols = jnp.arange(K)[None, None, :]
    preact = jnp.zeros(xn.shape + (K,), jnp.float32)
    for r in range(4):
        preact = preact + basis[..., r:r + 1] * (idx[..., None] + r == cols)
    spline = jnp.einsum("bik,iko->bo", preact, coef)
    base = jnp.matmul(xn * jax.nn.sigmoid(xn), params["base_scale"])
    return (spline + base).reshape(*shape[:-1], O)


if __name__ == "__main__":
    n_int, input_dim, output_dim = 5, 32, 16
    key = jax.random.PRNGKey(0)
    kx, kp = jax.random.split(key)

    # x: (batch=2, const_dim=4, input_dim=32)  ->  flattened batch B = 8
    x = jax.random.normal(kx, (2, 4, input_dim), dtype=jnp.float32)
    params = init_params(kp, n_int, input_dim, output_dim)

    # one-time weight preparation (bf16 MXU operands, f32 accumulation in-kernel)
    w, _ = prepare_weights(params, n_int, mxu_dtype=jnp.bfloat16)

    out = kan_layer_forward(x, w, n_int, input_dim, output_dim)
    out = jax.block_until_ready(out)
    assert out.shape == (2, 4, output_dim), out.shape

    ref = _reference_forward(x, params, n_int)
    # bf16 MXU operands vs f32 reference -> relaxed tolerance
    assert jnp.allclose(out, ref, atol=2e-2, rtol=2e-2), \
        float(jnp.max(jnp.abs(out - ref)))

    print("KERNEL_OK")
</pallas_src>

<mosaic_0001>
module attributes {stable_mosaic.version = 11 : i64} {
  func.func @kan_kernel(%arg0: i32, %arg1: i32, %arg2: memref<8x32xf32, #tpu.memory_space<vmem>>, %arg3: memref<1x32xf32, #tpu.memory_space<vmem>>, %arg4: memref<1x32xf32, #tpu.memory_space<vmem>>, %arg5: memref<288x128xbf16, #tpu.memory_space<vmem>>, %arg6: memref<8x128xf32, #tpu.memory_space<vmem>>, %arg7: memref<8x288xf32, #tpu.memory_space<vmem>>) attributes {dimension_semantics = [#tpu.dimension_semantics<parallel>, #tpu.dimension_semantics<parallel>], iteration_bounds = array<i64: 1, 1>, scalar_prefetch = 0 : i64, scratch_operands = 1 : i64, tpu.core_type = #tpu.core_type<tc>, window_params = [{transform_indices = @transform_0, window_bounds = array<i64: 8, 32>}, {pipeline_mode = #tpu.pipeline_mode<synchronous>, transform_indices = @transform_1, window_bounds = array<i64: 1, 32>}, {pipeline_mode = #tpu.pipeline_mode<synchronous>, transform_indices = @transform_2, window_bounds = array<i64: 1, 32>}, {transform_indices = @transform_3, window_bounds = array<i64: 288, 128>}, {transform_indices = @transform_4, window_bounds = array<i64: 8, 128>}]} {
    %c0 = arith.constant 0 : index
    %c0_0 = arith.constant 0 : index
    %0 = vector.load %arg2[%c0, %c0_0] : memref<8x32xf32, #tpu.memory_space<vmem>>, vector<8x32xf32>
    %c0_1 = arith.constant 0 : index
    %c0_2 = arith.constant 0 : index
    %1 = vector.load %arg3[%c0_1, %c0_2] : memref<1x32xf32, #tpu.memory_space<vmem>>, vector<1x32xf32>
    %2 = vector.broadcast %1 : vector<1x32xf32> to vector<8x32xf32>
    %3 = arith.mulf %0, %2 : vector<8x32xf32>
    %c0_3 = arith.constant 0 : index
    %c0_4 = arith.constant 0 : index
    %4 = vector.load %arg4[%c0_3, %c0_4] : memref<1x32xf32, #tpu.memory_space<vmem>>, vector<1x32xf32>
    %5 = vector.broadcast %4 : vector<1x32xf32> to vector<8x32xf32>
    %6 = arith.addf %3, %5 : vector<8x32xf32>
    %7 = arith.negf %6 : vector<8x32xf32>
    %8 = math.exp %7 : vector<8x32xf32>
    %cst = arith.constant 1.000000e+00 : f32
    %9 = vector.broadcast %cst : f32 to vector<8x32xf32>
    %10 = arith.addf %9, %8 : vector<8x32xf32>
    %11 = arith.divf %9, %10 : vector<8x32xf32>
    %12 = arith.mulf %6, %11 : vector<8x32xf32>
    %c0_5 = arith.constant 0 : index
    %c256 = arith.constant 256 : index
    %13 = vector.load %arg7[%c0_5, %c256] : memref<8x288xf32, #tpu.memory_space<vmem>>, vector<8x32xf32>
    tpu.vector_store %arg7[%c0_5, %c256], %12 {strides = array<i32>} : memref<8x288xf32, #tpu.memory_space<vmem>>, vector<8x32xf32>,
    %cst_6 = arith.constant -1.000000e+00 : f32
    %cst_7 = arith.constant 1.000000e+00 : f32
    %14 = vector.broadcast %cst_6 : f32 to vector<8x32xf32>
    %15 = arith.maximumf %14, %6 : vector<8x32xf32>
    %16 = vector.broadcast %cst_7 : f32 to vector<8x32xf32>
    %17 = arith.minimumf %16, %15 : vector<8x32xf32>
    %cst_8 = arith.constant 1.000000e+00 : f32
    %18 = vector.broadcast %cst_8 : f32 to vector<8x32xf32>
    %19 = arith.addf %17, %18 : vector<8x32xf32>
    %cst_9 = arith.constant 2.500000e+00 : f32
    %20 = vector.broadcast %cst_9 : f32 to vector<8x32xf32>
    %21 = arith.mulf %19, %20 : vector<8x32xf32>
    %22 = math.floor %21 : vector<8x32xf32>
    %cst_10 = arith.constant 4.000000e+00 : f32
    %23 = vector.broadcast %cst_10 : f32 to vector<8x32xf32>
    %24 = arith.minimumf %22, %23 : vector<8x32xf32>
    %25 = arith.fptosi %24 : vector<8x32xf32> to vector<8x32xi32>
    %26 = arith.subf %21, %24 : vector<8x32xf32>
    %27 = arith.mulf %26, %26 : vector<8x32xf32>
    %28 = arith.mulf %27, %26 : vector<8x32xf32>
    %cst_11 = arith.constant 0.000000e+00 : f32
    %29 = vector.broadcast %cst_11 : f32 to vector<8x32xf32>
    %30 = arith.subf %29, %28 : vector<8x32xf32>
    %cst_12 = arith.constant 3.000000e+00 : f32
    %31 = vector.broadcast %cst_12 : f32 to vector<8x32xf32>
    %32 = arith.mulf %31, %27 : vector<8x32xf32>
    %33 = arith.addf %30, %32 : vector<8x32xf32>
    %cst_13 = arith.constant 3.000000e+00 : f32
    %34 = vector.broadcast %cst_13 : f32 to vector<8x32xf32>
    %35 = arith.mulf %34, %26 : vector<8x32xf32>
    %36 = arith.subf %33, %35 : vector<8x32xf32>
    %cst_14 = arith.constant 1.000000e+00 : f32
    %37 = vector.broadcast %cst_14 : f32 to vector<8x32xf32>
    %38 = arith.addf %36, %37 : vector<8x32xf32>
    %cst_15 = arith.constant 0.166666672 : f32
    %39 = vector.broadcast %cst_15 : f32 to vector<8x32xf32>
    %40 = arith.mulf %38, %39 : vector<8x32xf32>
    %cst_16 = arith.constant 3.000000e+00 : f32
    %41 = vector.broadcast %cst_16 : f32 to vector<8x32xf32>
    %42 = arith.mulf %41, %28 : vector<8x32xf32>
    %cst_17 = arith.constant 6.000000e+00 : f32
    %43 = vector.broadcast %cst_17 : f32 to vector<8x32xf32>
    %44 = arith.mulf %43, %27 : vector<8x32xf32>
    %45 = arith.subf %42, %44 : vector<8x32xf32>
    %cst_18 = arith.constant 4.000000e+00 : f32
    %46 = vector.broadcast %cst_18 : f32 to vector<8x32xf32>
    %47 = arith.addf %45, %46 : vector<8x32xf32>
    %cst_19 = arith.constant 0.166666672 : f32
    %48 = vector.broadcast %cst_19 : f32 to vector<8x32xf32>
    %49 = arith.mulf %47, %48 : vector<8x32xf32>
    %cst_20 = arith.constant -3.000000e+00 : f32
    %50 = vector.broadcast %cst_20 : f32 to vector<8x32xf32>
    %51 = arith.mulf %50, %28 : vector<8x32xf32>
    %cst_21 = arith.constant 3.000000e+00 : f32
    %52 = vector.broadcast %cst_21 : f32 to vector<8x32xf32>
    %53 = arith.mulf %52, %27 : vector<8x32xf32>
    %54 = arith.addf %51, %53 : vector<8x32xf32>
    %cst_22 = arith.constant 3.000000e+00 : f32
    %55 = vector.broadcast %cst_22 : f32 to vector<8x32xf32>
    %56 = arith.mulf %55, %26 : vector<8x32xf32>
    %57 = arith.addf %54, %56 : vector<8x32xf32>
    %cst_23 = arith.constant 1.000000e+00 : f32
    %58 = vector.broadcast %cst_23 : f32 to vector<8x32xf32>
    %59 = arith.addf %57, %58 : vector<8x32xf32>
    %cst_24 = arith.constant 0.166666672 : f32
    %60 = vector.broadcast %cst_24 : f32 to vector<8x32xf32>
    %61 = arith.mulf %59, %60 : vector<8x32xf32>
    %cst_25 = arith.constant 0.166666672 : f32
    %62 = vector.broadcast %cst_25 : f32 to vector<8x32xf32>
    %63 = arith.mulf %28, %62 : vector<8x32xf32>
    %c0_i32 = arith.constant 0 : i32
    %64 = vector.broadcast %c0_i32 : i32 to vector<8x32xi32>
    %65 = arith.cmpi eq, %25, %64 : vector<8x32xi32>
    %cst_26 = arith.constant 0.000000e+00 : f32
    %66 = vector.broadcast %cst_26 : f32 to vector<8x32xf32>
    %67 = arith.select %65, %40, %66 : vector<8x32xi1>, vector<8x32xf32>
    %c-1_i32 = arith.constant -1 : i32
    %68 = vector.broadcast %c-1_i32 : i32 to vector<8x32xi32>
    %69 = arith.cmpi eq, %25, %68 : vector<8x32xi32>
    %cst_27 = arith.constant 0.000000e+00 : f32
    %70 = vector.broadcast %cst_27 : f32 to vector<8x32xf32>
    %71 = arith.select %69, %49, %70 : vector<8x32xi1>, vector<8x32xf32>
    %72 = arith.addf %67, %71 : vector<8x32xf32>
    %c-2_i32 = arith.constant -2 : i32
    %73 = vector.broadcast %c-2_i32 : i32 to vector<8x32xi32>
    %74 = arith.cmpi eq, %25, %73 : vector<8x32xi32>
    %cst_28 = arith.constant 0.000000e+00 : f32
    %75 = vector.broadcast %cst_28 : f32 to vector<8x32xf32>
    %76 = arith.select %74, %61, %75 : vector<8x32xi1>, vector<8x32xf32>
    %77 = arith.addf %72, %76 : vector<8x32xf32>
    %c-3_i32 = arith.constant -3 : i32
    %78 = vector.broadcast %c-3_i32 : i32 to vector<8x32xi32>
    %79 = arith.cmpi eq, %25, %78 : vector<8x32xi32>
    %cst_29 = arith.constant 0.000000e+00 : f32
    %80 = vector.broadcast %cst_29 : f32 to vector<8x32xf32>
    %81 = arith.select %79, %63, %80 : vector<8x32xi1>, vector<8x32xf32>
    %82 = arith.addf %77, %81 : vector<8x32xf32>
    %c0_30 = arith.constant 0 : index
    %c0_31 = arith.constant 0 : index
    %83 = vector.load %arg7[%c0_30, %c0_31] : memref<8x288xf32, #tpu.memory_space<vmem>>, vector<8x32xf32>
    tpu.vector_store %arg7[%c0_30, %c0_31], %82 {strides = array<i32>} : memref<8x288xf32, #tpu.memory_space<vmem>>, vector<8x32xf32>,
    %c1_i32 = arith.constant 1 : i32
    %84 = vector.broadcast %c1_i32 : i32 to vector<8x32xi32>
    %85 = arith.cmpi eq, %25, %84 : vector<8x32xi32>
    %cst_32 = arith.constant 0.000000e+00 : f32
    %86 = vector.broadcast %cst_32 : f32 to vector<8x32xf32>
    %87 = arith.select %85, %40, %86 : vector<8x32xi1>, vector<8x32xf32>
    %c0_i32_33 = arith.constant 0 : i32
    %88 = vector.broadcast %c0_i32_33 : i32 to vector<8x32xi32>
    %89 = arith.cmpi eq, %25, %88 : vector<8x32xi32>
    %cst_34 = arith.constant 0.000000e+00 : f32
    %90 = vector.broadcast %cst_34 : f32 to vector<8x32xf32>
    %91 = arith.select %89, %49, %90 : vector<8x32xi1>, vector<8x32xf32>
    %92 = arith.addf %87, %91 : vector<8x32xf32>
    %c-1_i32_35 = arith.constant -1 : i32
    %93 = vector.broadcast %c-1_i32_35 : i32 to vector<8x32xi32>
    %94 = arith.cmpi eq, %25, %93 : vector<8x32xi32>
    %cst_36 = arith.constant 0.000000e+00 : f32
    %95 = vector.broadcast %cst_36 : f32 to vector<8x32xf32>
    %96 = arith.select %94, %61, %95 : vector<8x32xi1>, vector<8x32xf32>
    %97 = arith.addf %92, %96 : vector<8x32xf32>
    %c-2_i32_37 = arith.constant -2 : i32
    %98 = vector.broadcast %c-2_i32_37 : i32 to vector<8x32xi32>
    %99 = arith.cmpi eq, %25, %98 : vector<8x32xi32>
    %cst_38 = arith.constant 0.000000e+00 : f32
    %100 = vector.broadcast %cst_38 : f32 to vector<8x32xf32>
    %101 = arith.select %99, %63, %100 : vector<8x32xi1>, vector<8x32xf32>
    %102 = arith.addf %97, %101 : vector<8x32xf32>
    %c0_39 = arith.constant 0 : index
    %c32 = arith.constant 32 : index
    %103 = vector.load %arg7[%c0_39, %c32] : memref<8x288xf32, #tpu.memory_space<vmem>>, vector<8x32xf32>
    tpu.vector_store %arg7[%c0_39, %c32], %102 {strides = array<i32>} : memref<8x288xf32, #tpu.memory_space<vmem>>, vector<8x32xf32>,
    %c2_i32 = arith.constant 2 : i32
    %104 = vector.broadcast %c2_i32 : i32 to vector<8x32xi32>
    %105 = arith.cmpi eq, %25, %104 : vector<8x32xi32>
    %cst_40 = arith.constant 0.000000e+00 : f32
    %106 = vector.broadcast %cst_40 : f32 to vector<8x32xf32>
    %107 = arith.select %105, %40, %106 : vector<8x32xi1>, vector<8x32xf32>
    %c1_i32_41 = arith.constant 1 : i32
    %108 = vector.broadcast %c1_i32_41 : i32 to vector<8x32xi32>
    %109 = arith.cmpi eq, %25, %108 : vector<8x32xi32>
    %cst_42 = arith.constant 0.000000e+00 : f32
    %110 = vector.broadcast %cst_42 : f32 to vector<8x32xf32>
    %111 = arith.select %109, %49, %110 : vector<8x32xi1>, vector<8x32xf32>
    %112 = arith.addf %107, %111 : vector<8x32xf32>
    %c0_i32_43 = arith.constant 0 : i32
    %113 = vector.broadcast %c0_i32_43 : i32 to vector<8x32xi32>
    %114 = arith.cmpi eq, %25, %113 : vector<8x32xi32>
    %cst_44 = arith.constant 0.000000e+00 : f32
    %115 = vector.broadcast %cst_44 : f32 to vector<8x32xf32>
    %116 = arith.select %114, %61, %115 : vector<8x32xi1>, vector<8x32xf32>
    %117 = arith.addf %112, %116 : vector<8x32xf32>
    %c-1_i32_45 = arith.constant -1 : i32
    %118 = vector.broadcast %c-1_i32_45 : i32 to vector<8x32xi32>
    %119 = arith.cmpi eq, %25, %118 : vector<8x32xi32>
    %cst_46 = arith.constant 0.000000e+00 : f32
    %120 = vector.broadcast %cst_46 : f32 to vector<8x32xf32>
    %121 = arith.select %119, %63, %120 : vector<8x32xi1>, vector<8x32xf32>
    %122 = arith.addf %117, %121 : vector<8x32xf32>
    %c0_47 = arith.constant 0 : index
    %c64 = arith.constant 64 : index
    %123 = vector.load %arg7[%c0_47, %c64] : memref<8x288xf32, #tpu.memory_space<vmem>>, vector<8x32xf32>
    tpu.vector_store %arg7[%c0_47, %c64], %122 {strides = array<i32>} : memref<8x288xf32, #tpu.memory_space<vmem>>, vector<8x32xf32>,
    %c3_i32 = arith.constant 3 : i32
    %124 = vector.broadcast %c3_i32 : i32 to vector<8x32xi32>
    %125 = arith.cmpi eq, %25, %124 : vector<8x32xi32>
    %cst_48 = arith.constant 0.000000e+00 : f32
    %126 = vector.broadcast %cst_48 : f32 to vector<8x32xf32>
    %127 = arith.select %125, %40, %126 : vector<8x32xi1>, vector<8x32xf32>
    %c2_i32_49 = arith.constant 2 : i32
    %128 = vector.broadcast %c2_i32_49 : i32 to vector<8x32xi32>
    %129 = arith.cmpi eq, %25, %128 : vector<8x32xi32>
    %cst_50 = arith.constant 0.000000e+00 : f32
    %130 = vector.broadcast %cst_50 : f32 to vector<8x32xf32>
    %131 = arith.select %129, %49, %130 : vector<8x32xi1>, vector<8x32xf32>
    %132 = arith.addf %127, %131 : vector<8x32xf32>
    %c1_i32_51 = arith.constant 1 : i32
    %133 = vector.broadcast %c1_i32_51 : i32 to vector<8x32xi32>
    %134 = arith.cmpi eq, %25, %133 : vector<8x32xi32>
    %cst_52 = arith.constant 0.000000e+00 : f32
    %135 = vector.broadcast %cst_52 : f32 to vector<8x32xf32>
    %136 = arith.select %134, %61, %135 : vector<8x32xi1>, vector<8x32xf32>
    %137 = arith.addf %132, %136 : vector<8x32xf32>
    %c0_i32_53 = arith.constant 0 : i32
    %138 = vector.broadcast %c0_i32_53 : i32 to vector<8x32xi32>
    %139 = arith.cmpi eq, %25, %138 : vector<8x32xi32>
    %cst_54 = arith.constant 0.000000e+00 : f32
    %140 = vector.broadcast %cst_54 : f32 to vector<8x32xf32>
    %141 = arith.select %139, %63, %140 : vector<8x32xi1>, vector<8x32xf32>
    %142 = arith.addf %137, %141 : vector<8x32xf32>
    %c0_55 = arith.constant 0 : index
    %c96 = arith.constant 96 : index
    %143 = vector.load %arg7[%c0_55, %c96] : memref<8x288xf32, #tpu.memory_space<vmem>>, vector<8x32xf32>
    tpu.vector_store %arg7[%c0_55, %c96], %142 {strides = array<i32>} : memref<8x288xf32, #tpu.memory_space<vmem>>, vector<8x32xf32>,
    %c4_i32 = arith.constant 4 : i32
    %144 = vector.broadcast %c4_i32 : i32 to vector<8x32xi32>
    %145 = arith.cmpi eq, %25, %144 : vector<8x32xi32>
    %cst_56 = arith.constant 0.000000e+00 : f32
    %146 = vector.broadcast %cst_56 : f32 to vector<8x32xf32>
    %147 = arith.select %145, %40, %146 : vector<8x32xi1>, vector<8x32xf32>
    %c3_i32_57 = arith.constant 3 : i32
    %148 = vector.broadcast %c3_i32_57 : i32 to vector<8x32xi32>
    %149 = arith.cmpi eq, %25, %148 : vector<8x32xi32>
    %cst_58 = arith.constant 0.000000e+00 : f32
    %150 = vector.broadcast %cst_58 : f32 to vector<8x32xf32>
    %151 = arith.select %149, %49, %150 : vector<8x32xi1>, vector<8x32xf32>
    %152 = arith.addf %147, %151 : vector<8x32xf32>
    %c2_i32_59 = arith.constant 2 : i32
    %153 = vector.broadcast %c2_i32_59 : i32 to vector<8x32xi32>
    %154 = arith.cmpi eq, %25, %153 : vector<8x32xi32>
    %cst_60 = arith.constant 0.000000e+00 : f32
    %155 = vector.broadcast %cst_60 : f32 to vector<8x32xf32>
    %156 = arith.select %154, %61, %155 : vector<8x32xi1>, vector<8x32xf32>
    %157 = arith.addf %152, %156 : vector<8x32xf32>
    %c1_i32_61 = arith.constant 1 : i32
    %158 = vector.broadcast %c1_i32_61 : i32 to vector<8x32xi32>
    %159 = arith.cmpi eq, %25, %158 : vector<8x32xi32>
    %cst_62 = arith.constant 0.000000e+00 : f32
    %160 = vector.broadcast %cst_62 : f32 to vector<8x32xf32>
    %161 = arith.select %159, %63, %160 : vector<8x32xi1>, vector<8x32xf32>
    %162 = arith.addf %157, %161 : vector<8x32xf32>
    %c0_63 = arith.constant 0 : index
    %c128 = arith.constant 128 : index
    %163 = vector.load %arg7[%c0_63, %c128] : memref<8x288xf32, #tpu.memory_space<vmem>>, vector<8x32xf32>
    tpu.vector_store %arg7[%c0_63, %c128], %162 {strides = array<i32>} : memref<8x288xf32, #tpu.memory_space<vmem>>, vector<8x32xf32>,
    %c5_i32 = arith.constant 5 : i32
    %164 = vector.broadcast %c5_i32 : i32 to vector<8x32xi32>
    %165 = arith.cmpi eq, %25, %164 : vector<8x32xi32>
    %cst_64 = arith.constant 0.000000e+00 : f32
    %166 = vector.broadcast %cst_64 : f32 to vector<8x32xf32>
    %167 = arith.select %165, %40, %166 : vector<8x32xi1>, vector<8x32xf32>
    %c4_i32_65 = arith.constant 4 : i32
    %168 = vector.broadcast %c4_i32_65 : i32 to vector<8x32xi32>
    %169 = arith.cmpi eq, %25, %168 : vector<8x32xi32>
    %cst_66 = arith.constant 0.000000e+00 : f32
    %170 = vector.broadcast %cst_66 : f32 to vector<8x32xf32>
    %171 = arith.select %169, %49, %170 : vector<8x32xi1>, vector<8x32xf32>
    %172 = arith.addf %167, %171 : vector<8x32xf32>
    %c3_i32_67 = arith.constant 3 : i32
    %173 = vector.broadcast %c3_i32_67 : i32 to vector<8x32xi32>
    %174 = arith.cmpi eq, %25, %173 : vector<8x32xi32>
    %cst_68 = arith.constant 0.000000e+00 : f32
    %175 = vector.broadcast %cst_68 : f32 to vector<8x32xf32>
    %176 = arith.select %174, %61, %175 : vector<8x32xi1>, vector<8x32xf32>
    %177 = arith.addf %172, %176 : vector<8x32xf32>
    %c2_i32_69 = arith.constant 2 : i32
    %178 = vector.broadcast %c2_i32_69 : i32 to vector<8x32xi32>
    %179 = arith.cmpi eq, %25, %178 : vector<8x32xi32>
    %cst_70 = arith.constant 0.000000e+00 : f32
    %180 = vector.broadcast %cst_70 : f32 to vector<8x32xf32>
    %181 = arith.select %179, %63, %180 : vector<8x32xi1>, vector<8x32xf32>
    %182 = arith.addf %177, %181 : vector<8x32xf32>
    %c0_71 = arith.constant 0 : index
    %c160 = arith.constant 160 : index
    %183 = vector.load %arg7[%c0_71, %c160] : memref<8x288xf32, #tpu.memory_space<vmem>>, vector<8x32xf32>
    tpu.vector_store %arg7[%c0_71, %c160], %182 {strides = array<i32>} : memref<8x288xf32, #tpu.memory_space<vmem>>, vector<8x32xf32>,
    %c6_i32 = arith.constant 6 : i32
    %184 = vector.broadcast %c6_i32 : i32 to vector<8x32xi32>
    %185 = arith.cmpi eq, %25, %184 : vector<8x32xi32>
    %cst_72 = arith.constant 0.000000e+00 : f32
    %186 = vector.broadcast %cst_72 : f32 to vector<8x32xf32>
    %187 = arith.select %185, %40, %186 : vector<8x32xi1>, vector<8x32xf32>
    %c5_i32_73 = arith.constant 5 : i32
    %188 = vector.broadcast %c5_i32_73 : i32 to vector<8x32xi32>
    %189 = arith.cmpi eq, %25, %188 : vector<8x32xi32>
    %cst_74 = arith.constant 0.000000e+00 : f32
    %190 = vector.broadcast %cst_74 : f32 to vector<8x32xf32>
    %191 = arith.select %189, %49, %190 : vector<8x32xi1>, vector<8x32xf32>
    %192 = arith.addf %187, %191 : vector<8x32xf32>
    %c4_i32_75 = arith.constant 4 : i32
    %193 = vector.broadcast %c4_i32_75 : i32 to vector<8x32xi32>
    %194 = arith.cmpi eq, %25, %193 : vector<8x32xi32>
    %cst_76 = arith.constant 0.000000e+00 : f32
    %195 = vector.broadcast %cst_76 : f32 to vector<8x32xf32>
    %196 = arith.select %194, %61, %195 : vector<8x32xi1>, vector<8x32xf32>
    %197 = arith.addf %192, %196 : vector<8x32xf32>
    %c3_i32_77 = arith.constant 3 : i32
    %198 = vector.broadcast %c3_i32_77 : i32 to vector<8x32xi32>
    %199 = arith.cmpi eq, %25, %198 : vector<8x32xi32>
    %cst_78 = arith.constant 0.000000e+00 : f32
    %200 = vector.broadcast %cst_78 : f32 to vector<8x32xf32>
    %201 = arith.select %199, %63, %200 : vector<8x32xi1>, vector<8x32xf32>
    %202 = arith.addf %197, %201 : vector<8x32xf32>
    %c0_79 = arith.constant 0 : index
    %c192 = arith.constant 192 : index
    %203 = vector.load %arg7[%c0_79, %c192] : memref<8x288xf32, #tpu.memory_space<vmem>>, vector<8x32xf32>
    tpu.vector_store %arg7[%c0_79, %c192], %202 {strides = array<i32>} : memref<8x288xf32, #tpu.memory_space<vmem>>, vector<8x32xf32>,
    %c7_i32 = arith.constant 7 : i32
    %204 = vector.broadcast %c7_i32 : i32 to vector<8x32xi32>
    %205 = arith.cmpi eq, %25, %204 : vector<8x32xi32>
    %cst_80 = arith.constant 0.000000e+00 : f32
    %206 = vector.broadcast %cst_80 : f32 to vector<8x32xf32>
    %207 = arith.select %205, %40, %206 : vector<8x32xi1>, vector<8x32xf32>
    %c6_i32_81 = arith.constant 6 : i32
    %208 = vector.broadcast %c6_i32_81 : i32 to vector<8x32xi32>
    %209 = arith.cmpi eq, %25, %208 : vector<8x32xi32>
    %cst_82 = arith.constant 0.000000e+00 : f32
    %210 = vector.broadcast %cst_82 : f32 to vector<8x32xf32>
    %211 = arith.select %209, %49, %210 : vector<8x32xi1>, vector<8x32xf32>
    %212 = arith.addf %207, %211 : vector<8x32xf32>
    %c5_i32_83 = arith.constant 5 : i32
    %213 = vector.broadcast %c5_i32_83 : i32 to vector<8x32xi32>
    %214 = arith.cmpi eq, %25, %213 : vector<8x32xi32>
    %cst_84 = arith.constant 0.000000e+00 : f32
    %215 = vector.broadcast %cst_84 : f32 to vector<8x32xf32>
    %216 = arith.select %214, %61, %215 : vector<8x32xi1>, vector<8x32xf32>
    %217 = arith.addf %212, %216 : vector<8x32xf32>
    %c4_i32_85 = arith.constant 4 : i32
    %218 = vector.broadcast %c4_i32_85 : i32 to vector<8x32xi32>
    %219 = arith.cmpi eq, %25, %218 : vector<8x32xi32>
    %cst_86 = arith.constant 0.000000e+00 : f32
    %220 = vector.broadcast %cst_86 : f32 to vector<8x32xf32>
    %221 = arith.select %219, %63, %220 : vector<8x32xi1>, vector<8x32xf32>
    %222 = arith.addf %217, %221 : vector<8x32xf32>
    %c0_87 = arith.constant 0 : index
    %c224 = arith.constant 224 : index
    %223 = vector.load %arg7[%c0_87, %c224] : memref<8x288xf32, #tpu.memory_space<vmem>>, vector<8x32xf32>
    tpu.vector_store %arg7[%c0_87, %c224], %222 {strides = array<i32>} : memref<8x288xf32, #tpu.memory_space<vmem>>, vector<8x32xf32>,
    %c0_88 = arith.constant 0 : index
    %c0_89 = arith.constant 0 : index
    %224 = vector.load %arg7[%c0_88, %c0_89] : memref<8x288xf32, #tpu.memory_space<vmem>>, vector<8x288xf32>
    %225 = arith.truncf %224 : vector<8x288xf32> to vector<8x288xbf16>
    %c0_90 = arith.constant 0 : index
    %c0_91 = arith.constant 0 : index
    %226 = vector.load %arg5[%c0_90, %c0_91] : memref<288x128xbf16, #tpu.memory_space<vmem>>, vector<288x128xbf16>
    %cst_92 = arith.constant dense<0.000000e+00> : vector<8x128xf32>
    %227 = tpu.matmul %225, %226, %cst_92 {dimension_numbers = #tpu.dot_dimension_numbers<[1], [0], [0], [1], [0, 0, 1, 1], [], []>} : vector<8x288xbf16>, vector<288x128xbf16>, vector<8x128xf32> -> vector<8x128xf32>
    %c0_93 = arith.constant 0 : index
    %c0_94 = arith.constant 0 : index
    %228 = vector.load %arg6[%c0_93, %c0_94] : memref<8x128xf32, #tpu.memory_space<vmem>>, vector<8x128xf32>
    tpu.vector_store %arg6[%c0_93, %c0_94], %227 {strides = array<i32>} : memref<8x128xf32, #tpu.memory_space<vmem>>, vector<8x128xf32>,
    return
  }
  func.func @transform_0(%arg0: i32, %arg1: i32) -> (i32, i32) {
    %c0_i32 = arith.constant 0 : i32
    %c0_i32_0 = arith.constant 0 : i32
    return %arg1, %c0_i32 : i32, i32
  }
  func.func @transform_1(%arg0: i32, %arg1: i32) -> (i32, i32) {
    %c0_i32 = arith.constant 0 : i32
    %c0_i32_0 = arith.constant 0 : i32
    %c0_i32_1 = arith.constant 0 : i32
    return %c0_i32, %c0_i32_0 : i32, i32
  }
  func.func @transform_2(%arg0: i32, %arg1: i32) -> (i32, i32) {
    %c0_i32 = arith.constant 0 : i32
    %c0_i32_0 = arith.constant 0 : i32
    %c0_i32_1 = arith.constant 0 : i32
    return %c0_i32, %c0_i32_0 : i32, i32
  }
  func.func @transform_3(%arg0: i32, %arg1: i32) -> (i32, i32) {
    %c0_i32 = arith.constant 0 : i32
    %c0_i32_0 = arith.constant 0 : i32
    return %c0_i32, %arg0 : i32, i32
  }
  func.func @transform_4(%arg0: i32, %arg1: i32) -> (i32, i32) {
    %c0_i32 = arith.constant 0 : i32
    return %arg1, %arg0 : i32, i32
  }
}

</mosaic_0001>

<bundles_post_ra>
// kernel: tpu_custom_call.1
= control target key start
LH: loop header
LB: loop body
LE: loop exit
PB: predicated region body
PF: predicated region fallthrough
CT: control target
= control target key end

     0   :  { %9 = vsyncpa [#allocation4], 0  ;;  %s818_s0 = inlined_call_operand.hbm [shape: f32[8,32], index: 0, kind: input, shape index: {}]   ;;  %s819_s1 = inlined_call_operand.vmem [shape: f32[1,32], index: 1, kind: input, shape index: {}]   ;;  %s820_s2 = inlined_call_operand.vmem [shape: f32[1,32], index: 2, kind: input, shape index: {}]   ;;  %s821_s3 = inlined_call_operand.hbm [shape: bf16[288,128], index: 3, kind: input, shape index: {}]   ;;  %s822_s4 = inlined_call_operand.hbm [shape: f32[8,128], index: 4, kind: output, shape index: {}]  }
   0x1   :  { %10 = vsyncpa [#allocation7], 0 }
   0x2   :  { %11 = vsyncpa [#allocation5], 0  ;;  %s612_s15 = smov [#allocation3]   ;;  %s613_s17 = smov [#allocation6]  }
   0x3   :  { %s18_s16 = sshll.u32 %s612_s15, 4  ;;  %s31_s18 = sshll.u32 %s613_s17, 4  ;;  %s19_s16 = int_to_ptr.vmem [resolvable:$true] %s18_s16  ;;  %s646_s18 = int_to_ptr.vmem [resolvable:$true] %s31_s18 }
   0x4   :  { %s540_s21 = scalar_lea.hbm %s818_s0, 128 }
   0x5   :  { %p541_p0 = scmp.ne.s32.totalorder %s818_s0, %s540_s21  ;;  %p544_p1 = scmp.lt.u32.totalorder %s540_s21, %s818_s0 }
   0x7   :  { %p546_p2 = pnand %p544_p1, %p541_p0 }
   0x9   :  { %549 = shalt.err (!%p546_p2)
}
   0xa   :  { %s550_s26 = scalar_lea.vmem %s19_s16, 128  ;;  %p555_p4 = scmp.lt.s32.totalorder %s19_s16, %s19_s16 }
   0xb   :  { %p551_p3 = scmp.ne.s32.totalorder %s19_s16, %s550_s26  ;;  %p556_p5 = scmp.lt.s32.totalorder %s550_s26, %s550_s26 }
   0xd   :  { %p557_p6 = por %p556_p5, %p555_p4 }
   0xf   :  { %p558_p7 = pnand %p557_p6, %p551_p3 }
  0x11   :  { %561 = shalt.err (!%p558_p7)
}
  0x12   :  { %21 = dma.hbm_to_vmem [thread:$0]  %s818_s0, 128, %s19_s16, [#allocation4]  }
  0x13   :  { %s562_s5 = scalar_lea.hbm %s821_s3, 2304 }
  0x14   :  { %p563_p8 = scmp.ne.s32.totalorder %s821_s3, %s562_s5  ;;  %p566_p9 = scmp.lt.u32.totalorder %s562_s5, %s821_s3 }
  0x16   :  { %p568_p10 = pnand %p566_p9, %p563_p8 }
  0x18   :  { %571 = shalt.err (!%p568_p10)
}
  0x19   :  { %s572_s10 = scalar_lea.vmem %s646_s18, 2304  ;;  %p577_p12 = scmp.lt.s32.totalorder %s646_s18, %s646_s18 }
  0x1a   :  { %p573_p11 = scmp.ne.s32.totalorder %s646_s18, %s572_s10  ;;  %p578_p13 = scmp.lt.s32.totalorder %s572_s10, %s572_s10 }
  0x1c   :  { %p579_p0 = por %p578_p13, %p577_p12 }
  0x1e   :  { %p580_p1 = pnand %p579_p0, %p573_p11 }
  0x20   :  { %583 = shalt.err (!%p580_p1)
}
  0x21   :  { %s614_s0 = smov 64   ;;  %s615_s11 = smov 4  }
  0x22   :  { %37 = dma.hbm_to_vmem [thread:$0]  %s821_s3, 2304, %s646_s18, [#allocation7], %s614_s0, %s614_s0, %s615_s11  }
  0x23   :  { %606 = dma.done.wait [#allocation4], 128  }
  0x24   :  { %607 = vsyncadd [#allocation4], 4294967168 }
  0x25   :  { %608 = dma.done.wait [#allocation7], 2304  }
  0x26   :  { %609 = vsyncadd [#allocation7], 4294964992  ;;  %v45_v0 = vld [vmem:[#allocation3] sm:$0xff]  ;;  %v451_v1 = vld [vmem:[%s819_s1] ss:$0 sm:$0xff]  ;;  %vm69_vm11 = vcmask 261120  }
  0x27   :  { %v452_v2 = vld [vmem:[%s820_s2] ss:$0 sm:$0xff]  ;;  %v53_v3 = vmul.f32 %v451_v1, %v45_v0  ;;  %v520_v7 = vld [vmem:[#allocation6 + $0x48] sm:$0xff]   ;;  %v522_v10 = vld [vmem:[#allocation6 + $0x50] sm:$0xff]   ;;  %s616_s1 = smov 32   ;;  %vm618_vm12 = vmmov 0  }
  0x28   :  { %v518_v4 = vld [vmem:[#allocation6 + $0x40] sm:$0xff]   ;;  %v521_v8 = vld [vmem:[#allocation6 + $0x8] sm:$0xff]   ;;  %v523_v12 = vld [vmem:[#allocation6 + $0x10] sm:$0xff]   ;;  %s619_s2 = smov 96   ;;  %vm123_vm13 = vcmask 523520   ;;  %vm137_vm14 = vcmask 785920  }
  0x29   :  { %v519_v5 = vld [vmem:[#allocation6] sm:$0xff]   ;;  %v685_v6 = vadd.f32 %v452_v2, %v53_v3  ;;  %474 = vmatprep.subr.bf16.mxu0 %v518_v4  ;;  %v524_v15 = vld [vmem:[#allocation6 + $0x58] sm:$0xff]   ;;  %v528_v59 = vld [vmem:[#allocation6 + $0x68] sm:$0xff]   ;;  %vm151_vm15 = vcmask 1048320   ;;  %s620_s3 = smov [#allocation8]  }
  0x2a   :  { %475 = vmatpush3.bf16.msra.mxu0 %v519_v5  ;;  %v525_v34 = vld [vmem:[#allocation6 + $0x18] sm:$0xff]   ;;  %v526_v43 = vld [vmem:[#allocation6 + $0x60] sm:$0xff]   ;;  %v529_v0 = vld [vmem:[#allocation6 + $0x28] sm:$0xff]   ;;  %s441_s18 = sshll.u32 %s620_s3, 4  ;;  %s442_s18 = int_to_ptr.vmem [resolvable:$true] %s441_s18 }
  0x2b   :  { %v454_v9 = vclamps-f32 %v685_v6, 1.0  ;;  %476 = vmatprep.subr.bf16.mxu0 %v520_v7  ;;  %v453_v13 = vmul.f32 -1.442695, %v685_v6  ;;  %v527_v48 = vld [vmem:[#allocation6 + $0x20] sm:$0xff]   ;;  %s584_s19 = scalar_lea.vmem %s442_s18, 128  ;;  %p589_p3 = scmp.lt.s32.totalorder %s442_s18, %s442_s18 }
  0x2c   :  { %p585_p2 = scmp.ne.s32.totalorder %s442_s18, %s584_s19  ;;  %p590_p4 = scmp.lt.s32.totalorder %s584_s19, %s584_s19 }
  0x2d   :  { %v73_v11 = vadd.f32 1.0, %v454_v9  ;;  %536 = vpow2.f32 %v453_v13 }
  0x2e   :  { %477 = vmatpush3.bf16.msra.mxu0 %v521_v8  ;;  %p591_p5 = por %p590_p4, %p589_p3 }
  0x2f   :  { %v74_v14 = vmul.f32 2.5, %v73_v11  ;;  %478 = vmatprep.subr.bf16.mxu0 %v522_v10 }
  0x30   :  { %p592_p6 = pnand %p591_p5, %p585_p2 }
  0x31   :  { %v75_v16 = vfloor.f32 %v74_v14 }
  0x32   :  { %479 = vmatpush3.bf16.msra.mxu0 %v523_v12 }
  0x33   :  { %v76_v17 = vmin.f32 %v75_v16, 4.0  ;;  %480 = vmatprep.subr.bf16.mxu0 %v524_v15  ;;  %v531_v15 = vld [vmem:[#allocation6 + $0x30] sm:$0xff]  }
  0x35   :  { %v507_v18 = vtrunc.f32 %v76_v17  ;;  %v78_v19 = vsub.f32 %v74_v14, %v76_v17  ;;  %v530_v14 = vld [vmem:[#allocation6 + $0x70] sm:$0xff]  }
  0x36   :  { %481 = vmatpush3.bf16.msra.mxu0 %v525_v34 }
  0x37   :  { %v79_v20 = vmul.f32 %v78_v19, %v78_v19  ;;  %v689_v21 = vcvt.f32.s32 %v507_v18  ;;  %v84_v25 = vmul.f32 3.0, %v78_v19  ;;  %v537_v30 = vpop.eup %536  ;;  %482 = vmatprep.subr.bf16.mxu0 %v526_v43 }
  0x38   :  { %v65_v42 = vadd.f32 1.0, %v537_v30 }
  0x39   :  { %v80_v22 = vmul.f32 %v79_v20, %v78_v19  ;;  %v82_v23 = vmul.f32 3.0, %v79_v20  ;;  %v89_v24 = vmul.f32 6.0, %v79_v20  ;;  %vm125_vm0 = vcmp.eq.s32.totalorder %v689_v21, 2  ;;  %v533_v20 = vld [vmem:[#allocation6 + $0x78] sm:$0xff]  }
  0x3a   :  { %vm139_vm1 = vcmp.eq.s32.totalorder %v689_v21, 3  ;;  %vm153_vm2 = vcmp.eq.s32.totalorder %v689_v21, 4  ;;  %vm162_vm3 = vcmp.eq.s32.totalorder %v689_v21, 5  ;;  %vm104_vm4 = vcmp.eq.s32.totalorder %v689_v21, 4294967294  ;;  %483 = vmatpush3.bf16.msra.mxu0 %v527_v48 }
  0x3b   :  { %v81_v26 = vsub.f32 0.0, %v80_v22  ;;  %v88_v27 = vmul.f32 3.0, %v80_v22  ;;  %v93_v28 = vmul.f32 -3.0, %v80_v22  ;;  %v692_v29 = vmul.f32 0.16666667, %v80_v22  ;;  %484 = vmatprep.subr.bf16.mxu0 %v528_v59 }
  0x3c   :  { %vm107_vm5 = vcmp.eq.s32.totalorder %v689_v21, 4294967293  ;;  %vm175_vm6 = vcmp.eq.s32.totalorder %v689_v21, 6  ;;  %vm99_vm7 = vcmp.eq.s32.totalorder %v689_v21, 0  ;;  %vm101_vm8 = vcmp.eq.s32.totalorder %v689_v21, 4294967295 }
  0x3d   :  { %v83_v31 = vadd.f32 %v82_v23, %v81_v26  ;;  %v90_v32 = vsub.f32 %v88_v27, %v89_v24  ;;  %v94_v33 = vadd.f32 %v93_v28, %v82_v23  ;;  %v168_v35 = vsel %vm125_vm0, %v692_v29, 0.0 }
  0x3e   :  { %v181_v39 = vsel %vm139_vm1, %v692_v29, 0.0  ;;  %v709_v40 = vsel %vm107_vm5, %v692_v29, 0.0  ;;  %vm111_vm9 = vcmp.eq.s32.totalorder %v689_v21, 1  ;;  %v715_v41 = vsel %vm104_vm4, %v692_v29, 0.0  ;;  %485 = vmatpush3.bf16.msra.mxu0 %v529_v0 }
  0x3f   :  { %v85_v36 = vsub.f32 %v83_v31, %v84_v25  ;;  %v91_v37 = vadd.f32 4.0, %v90_v32  ;;  %v95_v38 = vadd.f32 %v94_v33, %v84_v25  ;;  %v722_v47 = vsel %vm101_vm8, %v692_v29, 0.0  ;;  %486 = vmatprep.subr.bf16.mxu0 %v530_v14  ;;  %v534_v31 = vld [vmem:[#allocation6 + $0x38] sm:$0xff]  }
  0x40   :  { %vm188_vm10 = vcmp.eq.s32.totalorder %v689_v21, 7  ;;  %v728_v49 = vsel %vm153_vm2, %v692_v29, 0.0  ;;  %538 = vrcp.f32 %v65_v42  ;;  %v733_v50 = vsel %vm111_vm9, %v692_v29, 0.0 }
  0x41   :  { %v86_v44 = vadd.f32 1.0, %v85_v36  ;;  %v717_v45 = vmul.f32 0.16666667, %v91_v37  ;;  %v96_v46 = vadd.f32 1.0, %v95_v38 }
  0x42   :  { %487 = vmatpush3.bf16.msra.mxu0 %v531_v15 }
  0x43   :  { %v87_v51 = vmul.f32 0.16666667, %v86_v44  ;;  %v97_v52 = vmul.f32 0.16666667, %v96_v46  ;;  %v155_v53 = vsel %vm139_vm1, %v717_v45, 0.0  ;;  %v164_v54 = vsel %vm153_vm2, %v717_v45, 0.0  ;;  %488 = vmatprep.subr.bf16.mxu0 %v533_v20 }
  0x44   :  { %v177_v55 = vsel %vm162_vm3, %v717_v45, 0.0  ;;  %v190_v56 = vsel %vm175_vm6, %v717_v45, 0.0  ;;  %v102_v57 = vsel %vm101_vm8, %v717_v45, 0.0  ;;  %v113_v58 = vsel %vm99_vm7, %v717_v45, 0.0 }
  0x45   :  { %v154_v60 = vsel %vm153_vm2, %v87_v51, 0.0  ;;  %v163_v61 = vsel %vm162_vm3, %v87_v51, 0.0  ;;  %v166_v62 = vsel %vm139_vm1, %v97_v52, 0.0  ;;  %v157_v63 = vsel %vm125_vm0, %v97_v52, 0.0 }
  0x46   :  { %v156_v1 = vadd.f32 %v155_v53, %v154_v60  ;;  %v165_v2 = vadd.f32 %v164_v54, %v163_v61  ;;  %v176_v3 = vsel %vm175_vm6, %v87_v51, 0.0  ;;  %v179_v4 = vsel %vm153_vm2, %v97_v52, 0.0  ;;  %489 = vmatpush3.bf16.msra.mxu0 %v534_v31 }
  0x47   :  { %v178_v5 = vadd.f32 %v177_v55, %v176_v3  ;;  %v105_v7 = vsel %vm104_vm4, %v97_v52, 0.0  ;;  %v112_v8 = vsel %vm111_vm9, %v87_v51, 0.0  ;;  %v115_v9 = vsel %vm101_vm8, %v97_v52, 0.0 }
  0x48   :  { %v167_v10 = vadd.f32 %v166_v62, %v165_v2  ;;  %v158_v11 = vadd.f32 %v157_v63, %v156_v1  ;;  %v114_v12 = vadd.f32 %v113_v58, %v112_v8  ;;  %v100_v13 = vsel %vm99_vm7, %v87_v51, 0.0 }
  0x49   :  { %v180_v16 = vadd.f32 %v179_v4, %v178_v5  ;;  %v103_v17 = vadd.f32 %v102_v57, %v100_v13  ;;  %v126_v18 = vsel %vm125_vm0, %v87_v51, 0.0  ;;  %v127_v19 = vsel %vm111_vm9, %v717_v45, 0.0 }
  0x4a   :  { %v169_v22 = vadd.f32 %v168_v35, %v167_v10  ;;  %v116_v23 = vadd.f32 %v115_v9, %v114_v12  ;;  %v128_v24 = vadd.f32 %v127_v19, %v126_v18  ;;  %v129_v25 = vsel %vm99_vm7, %v97_v52, 0.0  ;;  %v539_v32 = vpop.eup %538 }
  0x4b   :  { %v182_v26 = vadd.f32 %v181_v39, %v180_v16  ;;  %v106_v27 = vadd.f32 %v105_v7, %v103_v17  ;;  %v189_v28 = vsel %vm188_vm10, %v87_v51, 0.0  ;;  %v192_v30 = vsel %vm162_vm3, %v97_v52, 0.0 }
  0x4c   :  { %171 = vrot.lane.b32.xlu0 %v169_v22, %s616_s1  ;;  %v118_v33 = vadd.f32 %v715_v41, %v116_v23  ;;  %v130_v34 = vadd.f32 %v129_v25, %v128_v24  ;;  %v191_v35 = vadd.f32 %v190_v56, %v189_v28  ;;  %v140_v36 = vsel %vm139_vm1, %v87_v51, 0.0  ;;  %v532_v41 = vld [vmem:[#allocation6 + $0x80] sm:$0xff]  }
  0x4d   :  { %184 = vrot.lane.b32.xlu1 %v182_v26, %s614_s0  ;;  %v109_v37 = vadd.f32 %v709_v40, %v106_v27  ;;  %v141_v38 = vsel %vm125_vm0, %v717_v45, 0.0  ;;  %v143_v39 = vsel %vm111_vm9, %v97_v52, 0.0  ;;  %v68_v42 = vmul.f32 %v539_v32, %v685_v6 }
  0x4e   :  { %v132_v43 = vadd.f32 %v722_v47, %v130_v34  ;;  %v193_v44 = vadd.f32 %v192_v30, %v191_v35  ;;  %v142_v46 = vadd.f32 %v141_v38, %v140_v36  ;;  %v160_v48 = vadd.f32 %v733_v50, %v158_v11  ;;  %v535_v50 = vld [vmem:[#allocation6 + $0x88] sm:$0xff]  }
  0x4f   :  { %v145_v40 = vsel %vm99_vm7, %v692_v29, 0.0  ;;  %70 = vst.msk [vmem:[#allocation2 + $0x10] sm:$0xff] %vm69_vm11, %v68_v42  ;;  %110 = vst.msk [vmem:[#allocation2] sm:$0xff] %vm69_vm11, %v109_v37  ;;  %v617_v47 = vmov 0.0  }
  0x50   :  { %120 = vrot.lane.b32.xlu0 %v118_v33, %s616_s1  ;;  %v195_v45 = vadd.f32 %v728_v49, %v193_v44  ;;  %v144_v6 = vadd.f32 %v143_v39, %v142_v46  ;;  %161 = vst.msk [vmem:[#allocation2 + $0x8] sm:$0xff] %vm69_vm11, %v160_v48  ;;  %499 = vmatprep.subr.bf16.mxu1 %v617_v47 }
  0x51   :  { %134 = vrot.lane.b32.xlu1 %v132_v43, %s614_s0  ;;  %500 = vmatpush3.bf16.msra.mxu1 %v532_v41 }
  0x52   :  { %v146_v51 = vadd.f32 %v145_v40, %v144_v6  ;;  %501 = vmatprep.subr.bf16.mxu1 %v617_v47  ;;  %503 = vmatprep.mubr.msk.bf16.mxu1 %vm618_vm12, %v617_v47 }
  0x54   :  { %197 = vrot.lane.b32.xlu0 %v195_v45, %s619_s2 }
  0x55   :  { %148 = vrot.lane.b32.xlu1 %v146_v51, %s619_s2  ;;  %502 = vmatpush3.bf16.msra.mxu1 %v535_v50 }
  0x56   :  { %v203_v21 = vld [vmem:[#allocation2 + $0x10] sm:$0xff] }
  0x57   :  { %v206_v29 = vpack.c.bf16 %v203_v21, %v203_v21 }
  0x59   :  { %504 = vmatmul.mubr.msk.bf16.vlgmr.msra.gmra.mrb[0].mxu1 %vm69_vm11, %v206_v29 }
  0xbe   :  { %v172_v49 = vpop.permute.xlu0 %171 }
  0xbf   :  { %174 = vst.msk [vmem:[#allocation2 + $0x8] sm:$0xff] %vm123_vm13, %v172_v49  ;;  %v185_v52 = vpop.permute.xlu1 %184 }
  0xc0   :  { %187 = vst.msk [vmem:[#allocation2 + $0x8] sm:$0xff] %vm137_vm14, %v185_v52 }
  0xc2   :  { %v121_v53 = vpop.permute.xlu0 %120 }
  0xc3   :  { %124 = vst.msk [vmem:[#allocation2] sm:$0xff] %vm123_vm13, %v121_v53  ;;  %v135_v54 = vpop.permute.xlu1 %134 }
  0xc4   :  { %138 = vst.msk [vmem:[#allocation2] sm:$0xff] %vm137_vm14, %v135_v54 }
  0xc6   :  { %v198_v55 = vpop.permute.xlu0 %197 }
  0xc7   :  { %200 = vst.msk [vmem:[#allocation2 + $0x8] sm:$0xff] %vm151_vm15, %v198_v55  ;;  %v149_v56 = vpop.permute.xlu1 %148 }
  0xc8   :  { %152 = vst.msk [vmem:[#allocation2] sm:$0xff] %vm151_vm15, %v149_v56 }
  0xce   :  { %v202_v57 = vld [vmem:[#allocation2 + $0x8] sm:$0xff] }
  0xcf   :  { %v205_v58 = vpack.c.bf16 %v202_v57, %v202_v57  ;;  %v201_v59 = vld [vmem:[#allocation2] sm:$0xff] }
  0xd0   :  { %v204_v60 = vpack.c.bf16 %v201_v59, %v201_v59 }
  0xd1   :  { %386 = vmatprep.mubr.bf16.mxu0 %v205_v58 }
  0xd2   :  { %387 = vmatmul.mubr.bf16.vlgmr.msra.gmra.mrb[0].mxu0 %v204_v60 }
 0x12c   :  { %v428_v61 = vpop.f32.mrb[0].mxu1 }
 0x12d   :  { %v505_v62 = vpop.f32.mrb[1].mxu1 }
 0x12e   :  { %v431_v63 = vpop.f32.mrb[2].mxu1 }
 0x12f   :  { %v506_v0 = vpop.f32.mrb[3].mxu1 }
 0x1a5   :  { %v490_v1 = vpop.f32.mrb[0].mxu0 }
 0x1a6   :  { %v491_v2 = vpop.f32.mrb[1].mxu0 }
 0x1a7   :  { %v492_v3 = vadd.f32 %v491_v2, %v490_v1  ;;  %v493_v4 = vpop.f32.mrb[2].mxu0 }
 0x1a8   :  { %v494_v5 = vpop.f32.mrb[3].mxu0 }
 0x1a9   :  { %v429_v7 = vadd.f32 %v492_v3, %v428_v61 }
 0x1ab   :  { %434 = vst [vmem:[#allocation8] sm:$0xff] %v429_v7 }
 0x1ac   :  { %595 = shalt.err (!%p592_p6)
}
 0x1ad   :  { %s596_s22 = scalar_lea.hbm %s822_s4, 128 }
 0x1ae   :  { %p597_p7 = scmp.ne.s32.totalorder %s822_s4, %s596_s22  ;;  %p600_p8 = scmp.lt.u32.totalorder %s596_s22, %s822_s4 }
 0x1b0   :  { %p602_p9 = pnand %p600_p8, %p597_p7 }
 0x1b2   :  { %605 = shalt.err (!%p602_p9)
}
 0x1b3   :  { %444 = dma.vmem_to_hbm [thread:$0]  %s442_s18, 128, %s822_s4, [#allocation5]  }
 0x1b4   :  { %610 = dma.done.wait [#allocation5], 128  }
 0x1b5   :  { %611 = vsyncadd [#allocation5], 4294967168 }
 0x1b6   :  { %448 = vsyncpa [#allocation4], 1 }
 0x1b7   :  { %449 = vsyncpa [#allocation7], 1 }
 0x1b8   :  { %450 = vsyncpa [#allocation5], 1 }

</bundles_post_ra>
